<compile_context>
chip_gen: v6e
topology: v6e:2x2x1
jax: 0.10.0
libtpu: 0.0.40
codegen_flags: <defaults>
</compile_context>

<pallas_src>
import jax
import jax.numpy as jnp
from jax.experimental import pallas as pl
from jax.experimental.pallas import tpu as pltpu

_EPS = 1e-5      # nn.LayerNorm / nn.GroupNorm default eps
_GROUPS = 8      # GroupNorm(8, 8*bottleneck)


def _dictionary_kernel(latent_ref, w1_ref, b1_ref, gamma_ref, beta_ref,
                       w2_ref, b2_ref, out_ref, x_ref):
    # ---- x = F.layer_norm(latent, (bottleneck,))  (no affine, two-pass) ----
    lat = latent_ref[...].astype(jnp.float32)
    mu = jnp.mean(lat, axis=-1, keepdims=True)
    var = jnp.mean((lat - mu) * (lat - mu), axis=-1, keepdims=True)
    x = (lat - mu) * jax.lax.rsqrt(var + _EPS)
    x_ref[...] = x.astype(x_ref.dtype)

    # ---- Linear(bottleneck -> 8*bottleneck): bf16 operands, f32 accumulate ----
    h = jnp.dot(x.astype(w1_ref.dtype), w1_ref[...],
                preferred_element_type=jnp.float32)
    h = h + b1_ref[...].astype(jnp.float32)

    # ---- GroupNorm(8, hidden) on (N, C): 8 aligned 128-lane slices, two-pass ----
    hidden = h.shape[1]
    gs = hidden // _GROUPS                      # = bottleneck = 128 -> lane aligned
    parts = []
    for g in range(_GROUPS):                    # static, unrolled; slices are views
        hg = h[:, g * gs:(g + 1) * gs]
        g_mu = jnp.mean(hg, axis=-1, keepdims=True)
        g_var = jnp.mean((hg - g_mu) * (hg - g_mu), axis=-1, keepdims=True)
        parts.append((hg - g_mu) * jax.lax.rsqrt(g_var + _EPS))
    hn = jnp.concatenate(parts, axis=-1)
    h = hn * gamma_ref[...].astype(jnp.float32) + beta_ref[...].astype(jnp.float32)

    # ---- ReLU ----
    h = jnp.maximum(h, 0.0)

    # ---- Linear(8*bottleneck -> num_chans*ph*pw) + Sigmoid ----
    y = jnp.dot(h.astype(w2_ref.dtype), w2_ref[...],
                preferred_element_type=jnp.float32)
    y = y + b2_ref[...].astype(jnp.float32)
    out_ref[...] = jax.nn.sigmoid(y).astype(out_ref.dtype)


def dictionary_forward(latent, w1, b1, gamma, beta, w2, b2, *, num_chans, patch_size):
    """Equivalent of Dictionary.forward(x=None) with no_layernorm=False."""
    n, bottleneck = latent.shape
    hidden = w1.shape[1]
    out_dim = w2.shape[1]
    assert hidden % _GROUPS == 0
    assert (hidden // _GROUPS) % 128 == 0, "group slices must be lane-aligned"

    # bf16 weights: halves the dominant HBM traffic; f32 accumulation in-kernel.
    w1_bf = w1.astype(jnp.bfloat16)
    w2_bf = w2.astype(jnp.bfloat16)

    # Row tiling: single tile when small; 256-row tiles (parallel axis) when batched.
    if n <= 256:
        tile_m = n
    else:
        tile_m = 256
        assert n % tile_m == 0, "row count must tile evenly by 256 when batched"
    grid = (n // tile_m,)

    def const(shape):  # grid-invariant resident block (weights / biases / affine)
        return pl.BlockSpec(shape, lambda i: (0, 0))

    out_flat, x = pl.pallas_call(
        _dictionary_kernel,
        grid=grid,
        out_shape=(
            jax.ShapeDtypeStruct((n, out_dim), jnp.float32),
            jax.ShapeDtypeStruct((n, bottleneck), jnp.float32),
        ),
        in_specs=[
            pl.BlockSpec((tile_m, bottleneck), lambda i: (i, 0)),   # latent rows
            const((bottleneck, hidden)),                            # w1 (bf16)
            const((1, hidden)),                                     # b1
            const((1, hidden)),                                     # gamma
            const((1, hidden)),                                     # beta
            const((hidden, out_dim)),                               # w2 (bf16)
            const((1, out_dim)),                                    # b2
        ],
        out_specs=(
            pl.BlockSpec((tile_m, out_dim), lambda i: (i, 0)),
            pl.BlockSpec((tile_m, bottleneck), lambda i: (i, 0)),
        ),
        compiler_params=pltpu.CompilerParams(
            dimension_semantics=("parallel",)),                     # 2 TCs on v7x
    )(latent, w1_bf, b1, gamma, beta, w2_bf, b2)

    out = out_flat.reshape(-1, num_chans, patch_size[0], patch_size[1])
    return out, x


def _reference_forward(latent, w1, b1, gamma, beta, w2, b2, *, num_chans, patch_size):
    """Pure-JAX f32 reference mirroring the PyTorch module."""
    mu = jnp.mean(latent, axis=-1, keepdims=True)
    var = jnp.mean((latent - mu) ** 2, axis=-1, keepdims=True)
    x = (latent - mu) / jnp.sqrt(var + _EPS)
    h = x @ w1 + b1
    n, hidden = h.shape
    hg = h.reshape(n, _GROUPS, hidden // _GROUPS)
    g_mu = jnp.mean(hg, axis=-1, keepdims=True)
    g_var = jnp.mean((hg - g_mu) ** 2, axis=-1, keepdims=True)
    h = ((hg - g_mu) / jnp.sqrt(g_var + _EPS)).reshape(n, hidden)
    h = h * gamma + beta
    h = jnp.maximum(h, 0.0)
    y = jax.nn.sigmoid(h @ w2 + b2)
    return y.reshape(-1, num_chans, patch_size[0], patch_size[1]), x


if __name__ == "__main__":
    # Small, forward-consistent sizes (shapes match the PyTorch module's __init__).
    num_classes = 8
    bottleneck = 128
    num_chans = 8
    patch_size = (4, 4)
    hidden = 8 * bottleneck                               # 1024
    out_dim = num_chans * patch_size[0] * patch_size[1]   # 128

    key = jax.random.PRNGKey(0)
    k_lat, k_w1, k_b1, k_w2, k_b2 = jax.random.split(key, 5)

    latent = jax.random.normal(k_lat, (num_classes, bottleneck), dtype=jnp.float32)
    w1 = jax.random.normal(k_w1, (bottleneck, hidden), dtype=jnp.float32) * 0.05
    b1 = jax.random.normal(k_b1, (1, hidden), dtype=jnp.float32) * 0.05
    gamma = jnp.ones((1, hidden), dtype=jnp.float32)      # GroupNorm default weight
    beta = jnp.zeros((1, hidden), dtype=jnp.float32)      # GroupNorm default bias
    w2 = jax.random.normal(k_w2, (hidden, out_dim), dtype=jnp.float32) * 0.02
    b2 = jax.random.normal(k_b2, (1, out_dim), dtype=jnp.float32) * 0.02

    out, x = dictionary_forward(latent, w1, b1, gamma, beta, w2, b2,
                                num_chans=num_chans, patch_size=patch_size)
    jax.block_until_ready((out, x))

    assert out.shape == (num_classes, num_chans, patch_size[0], patch_size[1])
    assert x.shape == (num_classes, bottleneck)
    assert bool(jnp.all(jnp.isfinite(out))) and bool(jnp.all(jnp.isfinite(x)))

    # Correctness vs. f32 reference (loose tol on `out` due to bf16 weights).
    out_ref, x_ref = _reference_forward(latent, w1, b1, gamma, beta, w2, b2,
                                        num_chans=num_chans, patch_size=patch_size)
    assert bool(jnp.max(jnp.abs(x - x_ref)) < 1e-4)
    assert bool(jnp.max(jnp.abs(out - out_ref)) < 5e-2)

    print("KERNEL_OK")
</pallas_src>

<mosaic_0001>
module attributes {stable_mosaic.version = 11 : i64} {
  func.func @_dictionary_kernel(%arg0: i32, %arg1: memref<8x128xf32, #tpu.memory_space<vmem>>, %arg2: memref<128x1024xbf16, #tpu.memory_space<vmem>>, %arg3: memref<1x1024xf32, #tpu.memory_space<vmem>>, %arg4: memref<1x1024xf32, #tpu.memory_space<vmem>>, %arg5: memref<1x1024xf32, #tpu.memory_space<vmem>>, %arg6: memref<1024x128xbf16, #tpu.memory_space<vmem>>, %arg7: memref<1x128xf32, #tpu.memory_space<vmem>>, %arg8: memref<8x128xf32, #tpu.memory_space<vmem>>, %arg9: memref<8x128xf32, #tpu.memory_space<vmem>>) attributes {dimension_semantics = [#tpu.dimension_semantics<parallel>], iteration_bounds = array<i64: 1>, scalar_prefetch = 0 : i64, scratch_operands = 0 : i64, tpu.core_type = #tpu.core_type<tc>, window_params = [{transform_indices = @transform_0, window_bounds = array<i64: 8, 128>}, {pipeline_mode = #tpu.pipeline_mode<synchronous>, transform_indices = @transform_1, window_bounds = array<i64: 128, 1024>}, {pipeline_mode = #tpu.pipeline_mode<synchronous>, transform_indices = @transform_2, window_bounds = array<i64: 1, 1024>}, {pipeline_mode = #tpu.pipeline_mode<synchronous>, transform_indices = @transform_3, window_bounds = array<i64: 1, 1024>}, {pipeline_mode = #tpu.pipeline_mode<synchronous>, transform_indices = @transform_4, window_bounds = array<i64: 1, 1024>}, {pipeline_mode = #tpu.pipeline_mode<synchronous>, transform_indices = @transform_5, window_bounds = array<i64: 1024, 128>}, {pipeline_mode = #tpu.pipeline_mode<synchronous>, transform_indices = @transform_6, window_bounds = array<i64: 1, 128>}, {transform_indices = @transform_7, window_bounds = array<i64: 8, 128>}, {transform_indices = @transform_8, window_bounds = array<i64: 8, 128>}]} {
    %c0 = arith.constant 0 : index
    %c0_0 = arith.constant 0 : index
    %0 = vector.load %arg1[%c0, %c0_0] : memref<8x128xf32, #tpu.memory_space<vmem>>, vector<8x128xf32>
    %cst = arith.constant dense<0.000000e+00> : vector<8xf32>
    %1 = vector.multi_reduction <add>, %0, %cst [1] : vector<8x128xf32> to vector<8xf32>
    %2 = vector.shape_cast %1 : vector<8xf32> to vector<8x1xf32>
    %cst_1 = arith.constant 1.280000e+02 : f32
    %3 = vector.broadcast %cst_1 : f32 to vector<8x1xf32>
    %4 = arith.divf %2, %3 : vector<8x1xf32>
    %5 = vector.broadcast %4 : vector<8x1xf32> to vector<8x128xf32>
    %6 = arith.subf %0, %5 : vector<8x128xf32>
    %7 = vector.broadcast %4 : vector<8x1xf32> to vector<8x128xf32>
    %8 = arith.subf %0, %7 : vector<8x128xf32>
    %9 = arith.mulf %6, %8 : vector<8x128xf32>
    %cst_2 = arith.constant dense<0.000000e+00> : vector<8xf32>
    %10 = vector.multi_reduction <add>, %9, %cst_2 [1] : vector<8x128xf32> to vector<8xf32>
    %11 = vector.shape_cast %10 : vector<8xf32> to vector<8x1xf32>
    %cst_3 = arith.constant 1.280000e+02 : f32
    %12 = vector.broadcast %cst_3 : f32 to vector<8x1xf32>
    %13 = arith.divf %11, %12 : vector<8x1xf32>
    %14 = vector.broadcast %4 : vector<8x1xf32> to vector<8x128xf32>
    %15 = arith.subf %0, %14 : vector<8x128xf32>
    %cst_4 = arith.constant 9.99999974E-6 : f32
    %16 = vector.broadcast %cst_4 : f32 to vector<8x1xf32>
    %17 = arith.addf %13, %16 : vector<8x1xf32>
    %18 = math.rsqrt %17 : vector<8x1xf32>
    %19 = vector.broadcast %18 : vector<8x1xf32> to vector<8x128xf32>
    %20 = arith.mulf %15, %19 : vector<8x128xf32>
    %c0_5 = arith.constant 0 : index
    %c0_6 = arith.constant 0 : index
    %21 = vector.load %arg9[%c0_5, %c0_6] : memref<8x128xf32, #tpu.memory_space<vmem>>, vector<8x128xf32>
    tpu.vector_store %arg9[%c0_5, %c0_6], %20 {strides = array<i32>} : memref<8x128xf32, #tpu.memory_space<vmem>>, vector<8x128xf32>,
    %22 = arith.truncf %20 : vector<8x128xf32> to vector<8x128xbf16>
    %c0_7 = arith.constant 0 : index
    %c0_8 = arith.constant 0 : index
    %23 = vector.load %arg2[%c0_7, %c0_8] : memref<128x1024xbf16, #tpu.memory_space<vmem>>, vector<128x1024xbf16>
    %cst_9 = arith.constant dense<0.000000e+00> : vector<8x1024xf32>
    %24 = tpu.matmul %22, %23, %cst_9 {dimension_numbers = #tpu.dot_dimension_numbers<[1], [0], [0], [1], [0, 0, 1, 1], [], []>} : vector<8x128xbf16>, vector<128x1024xbf16>, vector<8x1024xf32> -> vector<8x1024xf32>
    %c0_10 = arith.constant 0 : index
    %c0_11 = arith.constant 0 : index
    %25 = vector.load %arg3[%c0_10, %c0_11] : memref<1x1024xf32, #tpu.memory_space<vmem>>, vector<1x1024xf32>
    %26 = vector.broadcast %25 : vector<1x1024xf32> to vector<8x1024xf32>
    %27 = arith.addf %24, %26 : vector<8x1024xf32>
    %28 = vector.extract_strided_slice %27 {offsets = [0, 0], sizes = [8, 128], strides = [1, 1]} : vector<8x1024xf32> to vector<8x128xf32>
    %cst_12 = arith.constant dense<0.000000e+00> : vector<8xf32>
    %29 = vector.multi_reduction <add>, %28, %cst_12 [1] : vector<8x128xf32> to vector<8xf32>
    %30 = vector.shape_cast %29 : vector<8xf32> to vector<8x1xf32>
    %cst_13 = arith.constant 1.280000e+02 : f32
    %31 = vector.broadcast %cst_13 : f32 to vector<8x1xf32>
    %32 = arith.divf %30, %31 : vector<8x1xf32>
    %33 = vector.broadcast %32 : vector<8x1xf32> to vector<8x128xf32>
    %34 = arith.subf %28, %33 : vector<8x128xf32>
    %35 = vector.broadcast %32 : vector<8x1xf32> to vector<8x128xf32>
    %36 = arith.subf %28, %35 : vector<8x128xf32>
    %37 = arith.mulf %34, %36 : vector<8x128xf32>
    %cst_14 = arith.constant dense<0.000000e+00> : vector<8xf32>
    %38 = vector.multi_reduction <add>, %37, %cst_14 [1] : vector<8x128xf32> to vector<8xf32>
    %39 = vector.shape_cast %38 : vector<8xf32> to vector<8x1xf32>
    %cst_15 = arith.constant 1.280000e+02 : f32
    %40 = vector.broadcast %cst_15 : f32 to vector<8x1xf32>
    %41 = arith.divf %39, %40 : vector<8x1xf32>
    %42 = vector.broadcast %32 : vector<8x1xf32> to vector<8x128xf32>
    %43 = arith.subf %28, %42 : vector<8x128xf32>
    %cst_16 = arith.constant 9.99999974E-6 : f32
    %44 = vector.broadcast %cst_16 : f32 to vector<8x1xf32>
    %45 = arith.addf %41, %44 : vector<8x1xf32>
    %46 = math.rsqrt %45 : vector<8x1xf32>
    %47 = vector.broadcast %46 : vector<8x1xf32> to vector<8x128xf32>
    %48 = arith.mulf %43, %47 : vector<8x128xf32>
    %49 = vector.extract_strided_slice %27 {offsets = [0, 128], sizes = [8, 128], strides = [1, 1]} : vector<8x1024xf32> to vector<8x128xf32>
    %cst_17 = arith.constant dense<0.000000e+00> : vector<8xf32>
    %50 = vector.multi_reduction <add>, %49, %cst_17 [1] : vector<8x128xf32> to vector<8xf32>
    %51 = vector.shape_cast %50 : vector<8xf32> to vector<8x1xf32>
    %cst_18 = arith.constant 1.280000e+02 : f32
    %52 = vector.broadcast %cst_18 : f32 to vector<8x1xf32>
    %53 = arith.divf %51, %52 : vector<8x1xf32>
    %54 = vector.broadcast %53 : vector<8x1xf32> to vector<8x128xf32>
    %55 = arith.subf %49, %54 : vector<8x128xf32>
    %56 = vector.broadcast %53 : vector<8x1xf32> to vector<8x128xf32>
    %57 = arith.subf %49, %56 : vector<8x128xf32>
    %58 = arith.mulf %55, %57 : vector<8x128xf32>
    %cst_19 = arith.constant dense<0.000000e+00> : vector<8xf32>
    %59 = vector.multi_reduction <add>, %58, %cst_19 [1] : vector<8x128xf32> to vector<8xf32>
    %60 = vector.shape_cast %59 : vector<8xf32> to vector<8x1xf32>
    %cst_20 = arith.constant 1.280000e+02 : f32
    %61 = vector.broadcast %cst_20 : f32 to vector<8x1xf32>
    %62 = arith.divf %60, %61 : vector<8x1xf32>
    %63 = vector.broadcast %53 : vector<8x1xf32> to vector<8x128xf32>
    %64 = arith.subf %49, %63 : vector<8x128xf32>
    %cst_21 = arith.constant 9.99999974E-6 : f32
    %65 = vector.broadcast %cst_21 : f32 to vector<8x1xf32>
    %66 = arith.addf %62, %65 : vector<8x1xf32>
    %67 = math.rsqrt %66 : vector<8x1xf32>
    %68 = vector.broadcast %67 : vector<8x1xf32> to vector<8x128xf32>
    %69 = arith.mulf %64, %68 : vector<8x128xf32>
    %70 = vector.extract_strided_slice %27 {offsets = [0, 256], sizes = [8, 128], strides = [1, 1]} : vector<8x1024xf32> to vector<8x128xf32>
    %cst_22 = arith.constant dense<0.000000e+00> : vector<8xf32>
    %71 = vector.multi_reduction <add>, %70, %cst_22 [1] : vector<8x128xf32> to vector<8xf32>
    %72 = vector.shape_cast %71 : vector<8xf32> to vector<8x1xf32>
    %cst_23 = arith.constant 1.280000e+02 : f32
    %73 = vector.broadcast %cst_23 : f32 to vector<8x1xf32>
    %74 = arith.divf %72, %73 : vector<8x1xf32>
    %75 = vector.broadcast %74 : vector<8x1xf32> to vector<8x128xf32>
    %76 = arith.subf %70, %75 : vector<8x128xf32>
    %77 = vector.broadcast %74 : vector<8x1xf32> to vector<8x128xf32>
    %78 = arith.subf %70, %77 : vector<8x128xf32>
    %79 = arith.mulf %76, %78 : vector<8x128xf32>
    %cst_24 = arith.constant dense<0.000000e+00> : vector<8xf32>
    %80 = vector.multi_reduction <add>, %79, %cst_24 [1] : vector<8x128xf32> to vector<8xf32>
    %81 = vector.shape_cast %80 : vector<8xf32> to vector<8x1xf32>
    %cst_25 = arith.constant 1.280000e+02 : f32
    %82 = vector.broadcast %cst_25 : f32 to vector<8x1xf32>
    %83 = arith.divf %81, %82 : vector<8x1xf32>
    %84 = vector.broadcast %74 : vector<8x1xf32> to vector<8x128xf32>
    %85 = arith.subf %70, %84 : vector<8x128xf32>
    %cst_26 = arith.constant 9.99999974E-6 : f32
    %86 = vector.broadcast %cst_26 : f32 to vector<8x1xf32>
    %87 = arith.addf %83, %86 : vector<8x1xf32>
    %88 = math.rsqrt %87 : vector<8x1xf32>
    %89 = vector.broadcast %88 : vector<8x1xf32> to vector<8x128xf32>
    %90 = arith.mulf %85, %89 : vector<8x128xf32>
    %91 = vector.extract_strided_slice %27 {offsets = [0, 384], sizes = [8, 128], strides = [1, 1]} : vector<8x1024xf32> to vector<8x128xf32>
    %cst_27 = arith.constant dense<0.000000e+00> : vector<8xf32>
    %92 = vector.multi_reduction <add>, %91, %cst_27 [1] : vector<8x128xf32> to vector<8xf32>
    %93 = vector.shape_cast %92 : vector<8xf32> to vector<8x1xf32>
    %cst_28 = arith.constant 1.280000e+02 : f32
    %94 = vector.broadcast %cst_28 : f32 to vector<8x1xf32>
    %95 = arith.divf %93, %94 : vector<8x1xf32>
    %96 = vector.broadcast %95 : vector<8x1xf32> to vector<8x128xf32>
    %97 = arith.subf %91, %96 : vector<8x128xf32>
    %98 = vector.broadcast %95 : vector<8x1xf32> to vector<8x128xf32>
    %99 = arith.subf %91, %98 : vector<8x128xf32>
    %100 = arith.mulf %97, %99 : vector<8x128xf32>
    %cst_29 = arith.constant dense<0.000000e+00> : vector<8xf32>
    %101 = vector.multi_reduction <add>, %100, %cst_29 [1] : vector<8x128xf32> to vector<8xf32>
    %102 = vector.shape_cast %101 : vector<8xf32> to vector<8x1xf32>
    %cst_30 = arith.constant 1.280000e+02 : f32
    %103 = vector.broadcast %cst_30 : f32 to vector<8x1xf32>
    %104 = arith.divf %102, %103 : vector<8x1xf32>
    %105 = vector.broadcast %95 : vector<8x1xf32> to vector<8x128xf32>
    %106 = arith.subf %91, %105 : vector<8x128xf32>
    %cst_31 = arith.constant 9.99999974E-6 : f32
    %107 = vector.broadcast %cst_31 : f32 to vector<8x1xf32>
    %108 = arith.addf %104, %107 : vector<8x1xf32>
    %109 = math.rsqrt %108 : vector<8x1xf32>
    %110 = vector.broadcast %109 : vector<8x1xf32> to vector<8x128xf32>
    %111 = arith.mulf %106, %110 : vector<8x128xf32>
    %112 = vector.extract_strided_slice %27 {offsets = [0, 512], sizes = [8, 128], strides = [1, 1]} : vector<8x1024xf32> to vector<8x128xf32>
    %cst_32 = arith.constant dense<0.000000e+00> : vector<8xf32>
    %113 = vector.multi_reduction <add>, %112, %cst_32 [1] : vector<8x128xf32> to vector<8xf32>
    %114 = vector.shape_cast %113 : vector<8xf32> to vector<8x1xf32>
    %cst_33 = arith.constant 1.280000e+02 : f32
    %115 = vector.broadcast %cst_33 : f32 to vector<8x1xf32>
    %116 = arith.divf %114, %115 : vector<8x1xf32>
    %117 = vector.broadcast %116 : vector<8x1xf32> to vector<8x128xf32>
    %118 = arith.subf %112, %117 : vector<8x128xf32>
    %119 = vector.broadcast %116 : vector<8x1xf32> to vector<8x128xf32>
    %120 = arith.subf %112, %119 : vector<8x128xf32>
    %121 = arith.mulf %118, %120 : vector<8x128xf32>
    %cst_34 = arith.constant dense<0.000000e+00> : vector<8xf32>
    %122 = vector.multi_reduction <add>, %121, %cst_34 [1] : vector<8x128xf32> to vector<8xf32>
    %123 = vector.shape_cast %122 : vector<8xf32> to vector<8x1xf32>
    %cst_35 = arith.constant 1.280000e+02 : f32
    %124 = vector.broadcast %cst_35 : f32 to vector<8x1xf32>
    %125 = arith.divf %123, %124 : vector<8x1xf32>
    %126 = vector.broadcast %116 : vector<8x1xf32> to vector<8x128xf32>
    %127 = arith.subf %112, %126 : vector<8x128xf32>
    %cst_36 = arith.constant 9.99999974E-6 : f32
    %128 = vector.broadcast %cst_36 : f32 to vector<8x1xf32>
    %129 = arith.addf %125, %128 : vector<8x1xf32>
    %130 = math.rsqrt %129 : vector<8x1xf32>
    %131 = vector.broadcast %130 : vector<8x1xf32> to vector<8x128xf32>
    %132 = arith.mulf %127, %131 : vector<8x128xf32>
    %133 = vector.extract_strided_slice %27 {offsets = [0, 640], sizes = [8, 128], strides = [1, 1]} : vector<8x1024xf32> to vector<8x128xf32>
    %cst_37 = arith.constant dense<0.000000e+00> : vector<8xf32>
    %134 = vector.multi_reduction <add>, %133, %cst_37 [1] : vector<8x128xf32> to vector<8xf32>
    %135 = vector.shape_cast %134 : vector<8xf32> to vector<8x1xf32>
    %cst_38 = arith.constant 1.280000e+02 : f32
    %136 = vector.broadcast %cst_38 : f32 to vector<8x1xf32>
    %137 = arith.divf %135, %136 : vector<8x1xf32>
    %138 = vector.broadcast %137 : vector<8x1xf32> to vector<8x128xf32>
    %139 = arith.subf %133, %138 : vector<8x128xf32>
    %140 = vector.broadcast %137 : vector<8x1xf32> to vector<8x128xf32>
    %141 = arith.subf %133, %140 : vector<8x128xf32>
    %142 = arith.mulf %139, %141 : vector<8x128xf32>
    %cst_39 = arith.constant dense<0.000000e+00> : vector<8xf32>
    %143 = vector.multi_reduction <add>, %142, %cst_39 [1] : vector<8x128xf32> to vector<8xf32>
    %144 = vector.shape_cast %143 : vector<8xf32> to vector<8x1xf32>
    %cst_40 = arith.constant 1.280000e+02 : f32
    %145 = vector.broadcast %cst_40 : f32 to vector<8x1xf32>
    %146 = arith.divf %144, %145 : vector<8x1xf32>
    %147 = vector.broadcast %137 : vector<8x1xf32> to vector<8x128xf32>
    %148 = arith.subf %133, %147 : vector<8x128xf32>
    %cst_41 = arith.constant 9.99999974E-6 : f32
    %149 = vector.broadcast %cst_41 : f32 to vector<8x1xf32>
    %150 = arith.addf %146, %149 : vector<8x1xf32>
    %151 = math.rsqrt %150 : vector<8x1xf32>
    %152 = vector.broadcast %151 : vector<8x1xf32> to vector<8x128xf32>
    %153 = arith.mulf %148, %152 : vector<8x128xf32>
    %154 = vector.extract_strided_slice %27 {offsets = [0, 768], sizes = [8, 128], strides = [1, 1]} : vector<8x1024xf32> to vector<8x128xf32>
    %cst_42 = arith.constant dense<0.000000e+00> : vector<8xf32>
    %155 = vector.multi_reduction <add>, %154, %cst_42 [1] : vector<8x128xf32> to vector<8xf32>
    %156 = vector.shape_cast %155 : vector<8xf32> to vector<8x1xf32>
    %cst_43 = arith.constant 1.280000e+02 : f32
    %157 = vector.broadcast %cst_43 : f32 to vector<8x1xf32>
    %158 = arith.divf %156, %157 : vector<8x1xf32>
    %159 = vector.broadcast %158 : vector<8x1xf32> to vector<8x128xf32>
    %160 = arith.subf %154, %159 : vector<8x128xf32>
    %161 = vector.broadcast %158 : vector<8x1xf32> to vector<8x128xf32>
    %162 = arith.subf %154, %161 : vector<8x128xf32>
    %163 = arith.mulf %160, %162 : vector<8x128xf32>
    %cst_44 = arith.constant dense<0.000000e+00> : vector<8xf32>
    %164 = vector.multi_reduction <add>, %163, %cst_44 [1] : vector<8x128xf32> to vector<8xf32>
    %165 = vector.shape_cast %164 : vector<8xf32> to vector<8x1xf32>
    %cst_45 = arith.constant 1.280000e+02 : f32
    %166 = vector.broadcast %cst_45 : f32 to vector<8x1xf32>
    %167 = arith.divf %165, %166 : vector<8x1xf32>
    %168 = vector.broadcast %158 : vector<8x1xf32> to vector<8x128xf32>
    %169 = arith.subf %154, %168 : vector<8x128xf32>
    %cst_46 = arith.constant 9.99999974E-6 : f32
    %170 = vector.broadcast %cst_46 : f32 to vector<8x1xf32>
    %171 = arith.addf %167, %170 : vector<8x1xf32>
    %172 = math.rsqrt %171 : vector<8x1xf32>
    %173 = vector.broadcast %172 : vector<8x1xf32> to vector<8x128xf32>
    %174 = arith.mulf %169, %173 : vector<8x128xf32>
    %175 = vector.extract_strided_slice %27 {offsets = [0, 896], sizes = [8, 128], strides = [1, 1]} : vector<8x1024xf32> to vector<8x128xf32>
    %cst_47 = arith.constant dense<0.000000e+00> : vector<8xf32>
    %176 = vector.multi_reduction <add>, %175, %cst_47 [1] : vector<8x128xf32> to vector<8xf32>
    %177 = vector.shape_cast %176 : vector<8xf32> to vector<8x1xf32>
    %cst_48 = arith.constant 1.280000e+02 : f32
    %178 = vector.broadcast %cst_48 : f32 to vector<8x1xf32>
    %179 = arith.divf %177, %178 : vector<8x1xf32>
    %180 = vector.broadcast %179 : vector<8x1xf32> to vector<8x128xf32>
    %181 = arith.subf %175, %180 : vector<8x128xf32>
    %182 = vector.broadcast %179 : vector<8x1xf32> to vector<8x128xf32>
    %183 = arith.subf %175, %182 : vector<8x128xf32>
    %184 = arith.mulf %181, %183 : vector<8x128xf32>
    %cst_49 = arith.constant dense<0.000000e+00> : vector<8xf32>
    %185 = vector.multi_reduction <add>, %184, %cst_49 [1] : vector<8x128xf32> to vector<8xf32>
    %186 = vector.shape_cast %185 : vector<8xf32> to vector<8x1xf32>
    %cst_50 = arith.constant 1.280000e+02 : f32
    %187 = vector.broadcast %cst_50 : f32 to vector<8x1xf32>
    %188 = arith.divf %186, %187 : vector<8x1xf32>
    %189 = vector.broadcast %179 : vector<8x1xf32> to vector<8x128xf32>
    %190 = arith.subf %175, %189 : vector<8x128xf32>
    %cst_51 = arith.constant 9.99999974E-6 : f32
    %191 = vector.broadcast %cst_51 : f32 to vector<8x1xf32>
    %192 = arith.addf %188, %191 : vector<8x1xf32>
    %193 = math.rsqrt %192 : vector<8x1xf32>
    %194 = vector.broadcast %193 : vector<8x1xf32> to vector<8x128xf32>
    %195 = arith.mulf %190, %194 : vector<8x128xf32>
    %196 = tpu.concatenate %48, %69, %90, %111, %132, %153, %174, %195 in 1 : vector<8x128xf32>, vector<8x128xf32>, vector<8x128xf32>, vector<8x128xf32>, vector<8x128xf32>, vector<8x128xf32>, vector<8x128xf32>, vector<8x128xf32> -> vector<8x1024xf32>
    %c0_52 = arith.constant 0 : index
    %c0_53 = arith.constant 0 : index
    %197 = vector.load %arg4[%c0_52, %c0_53] : memref<1x1024xf32, #tpu.memory_space<vmem>>, vector<1x1024xf32>
    %198 = vector.broadcast %197 : vector<1x1024xf32> to vector<8x1024xf32>
    %199 = arith.mulf %196, %198 : vector<8x1024xf32>
    %c0_54 = arith.constant 0 : index
    %c0_55 = arith.constant 0 : index
    %200 = vector.load %arg5[%c0_54, %c0_55] : memref<1x1024xf32, #tpu.memory_space<vmem>>, vector<1x1024xf32>
    %201 = vector.broadcast %200 : vector<1x1024xf32> to vector<8x1024xf32>
    %202 = arith.addf %199, %201 : vector<8x1024xf32>
    %cst_56 = arith.constant 0.000000e+00 : f32
    %203 = vector.broadcast %cst_56 : f32 to vector<8x1024xf32>
    %204 = arith.maximumf %202, %203 : vector<8x1024xf32>
    %205 = arith.truncf %204 : vector<8x1024xf32> to vector<8x1024xbf16>
    %c0_57 = arith.constant 0 : index
    %c0_58 = arith.constant 0 : index
    %206 = vector.load %arg6[%c0_57, %c0_58] : memref<1024x128xbf16, #tpu.memory_space<vmem>>, vector<1024x128xbf16>
    %cst_59 = arith.constant dense<0.000000e+00> : vector<8x128xf32>
    %207 = tpu.matmul %205, %206, %cst_59 {dimension_numbers = #tpu.dot_dimension_numbers<[1], [0], [0], [1], [0, 0, 1, 1], [], []>} : vector<8x1024xbf16>, vector<1024x128xbf16>, vector<8x128xf32> -> vector<8x128xf32>
    %c0_60 = arith.constant 0 : index
    %c0_61 = arith.constant 0 : index
    %208 = vector.load %arg7[%c0_60, %c0_61] : memref<1x128xf32, #tpu.memory_space<vmem>>, vector<1x128xf32>
    %209 = vector.broadcast %208 : vector<1x128xf32> to vector<8x128xf32>
    %210 = arith.addf %207, %209 : vector<8x128xf32>
    %211 = arith.negf %210 : vector<8x128xf32>
    %212 = math.exp %211 : vector<8x128xf32>
    %cst_62 = arith.constant 1.000000e+00 : f32
    %213 = vector.broadcast %cst_62 : f32 to vector<8x128xf32>
    %214 = arith.addf %213, %212 : vector<8x128xf32>
    %215 = arith.divf %213, %214 : vector<8x128xf32>
    %c0_63 = arith.constant 0 : index
    %c0_64 = arith.constant 0 : index
    %216 = vector.load %arg8[%c0_63, %c0_64] : memref<8x128xf32, #tpu.memory_space<vmem>>, vector<8x128xf32>
    tpu.vector_store %arg8[%c0_63, %c0_64], %215 {strides = array<i32>} : memref<8x128xf32, #tpu.memory_space<vmem>>, vector<8x128xf32>,
    return
  }
  func.func @transform_0(%arg0: i32) -> (i32, i32) {
    %c0_i32 = arith.constant 0 : i32
    %c0_i32_0 = arith.constant 0 : i32
    return %arg0, %c0_i32 : i32, i32
  }
  func.func @transform_1(%arg0: i32) -> (i32, i32) {
    %c0_i32 = arith.constant 0 : i32
    %c0_i32_0 = arith.constant 0 : i32
    %c0_i32_1 = arith.constant 0 : i32
    return %c0_i32, %c0_i32_0 : i32, i32
  }
  func.func @transform_2(%arg0: i32) -> (i32, i32) {
    %c0_i32 = arith.constant 0 : i32
    %c0_i32_0 = arith.constant 0 : i32
    %c0_i32_1 = arith.constant 0 : i32
    return %c0_i32, %c0_i32_0 : i32, i32
  }
  func.func @transform_3(%arg0: i32) -> (i32, i32) {
    %c0_i32 = arith.constant 0 : i32
    %c0_i32_0 = arith.constant 0 : i32
    %c0_i32_1 = arith.constant 0 : i32
    return %c0_i32, %c0_i32_0 : i32, i32
  }
  func.func @transform_4(%arg0: i32) -> (i32, i32) {
    %c0_i32 = arith.constant 0 : i32
    %c0_i32_0 = arith.constant 0 : i32
    %c0_i32_1 = arith.constant 0 : i32
    return %c0_i32, %c0_i32_0 : i32, i32
  }
  func.func @transform_5(%arg0: i32) -> (i32, i32) {
    %c0_i32 = arith.constant 0 : i32
    %c0_i32_0 = arith.constant 0 : i32
    %c0_i32_1 = arith.constant 0 : i32
    return %c0_i32, %c0_i32_0 : i32, i32
  }
  func.func @transform_6(%arg0: i32) -> (i32, i32) {
    %c0_i32 = arith.constant 0 : i32
    %c0_i32_0 = arith.constant 0 : i32
    %c0_i32_1 = arith.constant 0 : i32
    return %c0_i32, %c0_i32_0 : i32, i32
  }
  func.func @transform_7(%arg0: i32) -> (i32, i32) {
    %c0_i32 = arith.constant 0 : i32
    %c0_i32_0 = arith.constant 0 : i32
    return %arg0, %c0_i32 : i32, i32
  }
  func.func @transform_8(%arg0: i32) -> (i32, i32) {
    %c0_i32 = arith.constant 0 : i32
    %c0_i32_0 = arith.constant 0 : i32
    return %arg0, %c0_i32 : i32, i32
  }
}

</mosaic_0001>

<bundles_post_ra>
// kernel: tpu_custom_call.1
= control target key start
LH: loop header
LB: loop body
LE: loop exit
PB: predicated region body
PF: predicated region fallthrough
CT: control target
= control target key end

     0   :  { %14 = vsyncpa [#allocation3], 0  ;;  %s2337_s0 = inlined_call_operand.hbm [shape: f32[8,128], index: 0, kind: input, shape index: {}]   ;;  %s2338_s1 = inlined_call_operand.hbm [shape: bf16[128,1024], index: 1, kind: input, shape index: {}]   ;;  %s2339_s2 = inlined_call_operand.hbm [shape: f32[1,1024], index: 2, kind: input, shape index: {}]   ;;  %s2340_s3 = inlined_call_operand.hbm [shape: f32[1,1024], index: 3, kind: input, shape index: {}]   ;;  %s2341_s4 = inlined_call_operand.hbm [shape: f32[1,1024], index: 4, kind: input, shape index: {}]   ;;  %s2342_s5 = inlined_call_operand.hbm [shape: bf16[1024,128], index: 5, kind: input, shape index: {}]   ;;  %s2343_s6 = inlined_call_operand.vmem [shape: f32[1,128], index: 6, kind: input, shape index: {}]   ;;  %s2344_s7 = inlined_call_operand.hbm [shape: f32[8,128], index: 7, kind: output, shape index: {0}]   ;;  %s2345_s8 = inlined_call_operand.hbm [shape: f32[8,128], index: 8, kind: output, shape index: {1}]  }
   0x1   :  { %15 = vsyncpa [#allocation6], 0 }
   0x2   :  { %16 = vsyncpa [#allocation9], 0 }
   0x3   :  { %17 = vsyncpa [#allocation12], 0 }
   0x4   :  { %18 = vsyncpa [#allocation4], 0 }
   0x5   :  { %19 = vsyncpa [#allocation15], 0  ;;  %s2121_s27 = smov [#allocation5]  }
   0x6   :  { %s35_s28 = sshll.u32 %s2121_s27, 4  ;;  %s36_s28 = int_to_ptr.vmem [resolvable:$true] %s35_s28 }
   0x7   :  { %s1957_s29 = scalar_lea.vmem %s36_s28, 8192  ;;  %p1962_p1 = scmp.lt.s32.totalorder %s36_s28, %s36_s28 }
   0x8   :  { %p1958_p0 = scmp.ne.s32.totalorder %s36_s28, %s1957_s29  ;;  %p1963_p2 = scmp.lt.s32.totalorder %s1957_s29, %s1957_s29 }
   0xa   :  { %p1964_p3 = por %p1963_p2, %p1962_p1 }
   0xc   :  { %p1965_p4 = pnand %p1964_p3, %p1958_p0 }
   0xe   :  { %1968 = shalt.err (!%p1965_p4)
}
   0xf   :  { %s2122_s30 = smov 512   ;;  %s2123_s9 = smov 32  }
  0x10   :  { %41 = dma.hbm_to_vmem [thread:$0]  %s2338_s1, 8192, %s36_s28, [#allocation6], %s2122_s30, %s2122_s30, %s2123_s9  }
  0x11   :  { %s2124_s12 = smov [#allocation8]   ;;  %s2125_s14 = smov [#allocation2]  }
  0x12   :  { %s58_s13 = sshll.u32 %s2124_s12, 4  ;;  %s26_s15 = sshll.u32 %s2125_s14, 4  ;;  %s59_s13 = int_to_ptr.vmem [resolvable:$true] %s58_s13  ;;  %s27_s15 = int_to_ptr.vmem [resolvable:$true] %s26_s15 }
  0x13   :  { %s1977_s16 = scalar_lea.vmem %s59_s13, 128  ;;  %p1982_p6 = scmp.lt.s32.totalorder %s59_s13, %s59_s13 }
  0x14   :  { %p1978_p5 = scmp.ne.s32.totalorder %s59_s13, %s1977_s16  ;;  %p1983_p7 = scmp.lt.s32.totalorder %s1977_s16, %s1977_s16 }
  0x16   :  { %p1984_p8 = por %p1983_p7, %p1982_p6 }
  0x18   :  { %p1985_p9 = pnand %p1984_p8, %p1978_p5 }
  0x1a   :  { %1988 = shalt.err (!%p1985_p9)
}
  0x1b   :  { %61 = dma.hbm_to_vmem [thread:$0]  %s2340_s3, 128, %s59_s13, [#allocation9]  }
  0x1c   :  { %s1997_s19 = scalar_lea.vmem %s27_s15, 128  ;;  %p2002_p11 = scmp.lt.s32.totalorder %s27_s15, %s27_s15 }
  0x1d   :  { %p1998_p10 = scmp.ne.s32.totalorder %s27_s15, %s1997_s19  ;;  %p2003_p12 = scmp.lt.s32.totalorder %s1997_s19, %s1997_s19 }
  0x1f   :  { %p2004_p13 = por %p2003_p12, %p2002_p11 }
  0x21   :  { %p2005_p0 = pnand %p2004_p13, %p1998_p10 }
  0x23   :  { %2008 = shalt.err (!%p2005_p0)
}
  0x24   :  { %29 = dma.hbm_to_vmem [thread:$0]  %s2337_s0, 128, %s27_s15, [#allocation3]  }
  0x25   :  { %s2126_s21 = smov [#allocation7]   ;;  %s2127_s23 = smov [#allocation10]  }
  0x26   :  { %s48_s22 = sshll.u32 %s2126_s21, 4  ;;  %s68_s24 = sshll.u32 %s2127_s23, 4  ;;  %s49_s22 = int_to_ptr.vmem [resolvable:$true] %s48_s22  ;;  %s69_s24 = int_to_ptr.vmem [resolvable:$true] %s68_s24 }
  0x27   :  { %s2017_s25 = scalar_lea.vmem %s49_s22, 128  ;;  %p2022_p2 = scmp.lt.s32.totalorder %s49_s22, %s49_s22 }
  0x28   :  { %p2018_p1 = scmp.ne.s32.totalorder %s49_s22, %s2017_s25  ;;  %p2023_p3 = scmp.lt.s32.totalorder %s2017_s25, %s2017_s25 }
  0x2a   :  { %p2024_p4 = por %p2023_p3, %p2022_p2 }
  0x2c   :  { %p2025_p5 = pnand %p2024_p4, %p2018_p1 }
  0x2e   :  { %2028 = shalt.err (!%p2025_p5)
}
  0x2f   :  { %51 = dma.hbm_to_vmem [thread:$0]  %s2339_s2, 128, %s49_s22, [#allocation6]  }
  0x30   :  { %s2037_s27 = scalar_lea.vmem %s69_s24, 128  ;;  %p2042_p7 = scmp.lt.s32.totalorder %s69_s24, %s69_s24 }
  0x31   :  { %p2038_p6 = scmp.ne.s32.totalorder %s69_s24, %s2037_s27  ;;  %p2043_p8 = scmp.lt.s32.totalorder %s2037_s27, %s2037_s27 }
  0x33   :  { %p2044_p9 = por %p2043_p8, %p2042_p7 }
  0x35   :  { %p2045_p10 = pnand %p2044_p9, %p2038_p6 }
  0x37   :  { %2048 = shalt.err (!%p2045_p10)
}
  0x38   :  { %71 = dma.hbm_to_vmem [thread:$0]  %s2341_s4, 128, %s69_s24, [#allocation9]  }
  0x39   :  { %s2128_s29 = smov [#allocation11]  }
  0x3a   :  { %s77_s30 = sshll.u32 %s2128_s29, 4  ;;  %s78_s30 = int_to_ptr.vmem [resolvable:$true] %s77_s30 }
  0x3b   :  { %s2057_s9 = scalar_lea.vmem %s78_s30, 8192  ;;  %p2062_p12 = scmp.lt.s32.totalorder %s78_s30, %s78_s30 }
  0x3c   :  { %p2058_p11 = scmp.ne.s32.totalorder %s78_s30, %s2057_s9  ;;  %p2063_p13 = scmp.lt.s32.totalorder %s2057_s9, %s2057_s9 }
  0x3e   :  { %p2064_p0 = por %p2063_p13, %p2062_p12 }
  0x40   :  { %p2065_p1 = pnand %p2064_p0, %p2058_p11 }
  0x42   :  { %2068 = shalt.err (!%p2065_p1)
}
  0x43   :  { %s2129_s2 = smov 64   ;;  %s2130_s10 = smov 4  }
  0x44   :  { %83 = dma.hbm_to_vmem [thread:$0]  %s2342_s5, 8192, %s78_s30, [#allocation12], %s2129_s2, %s2129_s2, %s2130_s10  }
  0x45   :  { %2109 = dma.done.wait [#allocation3], 128  }
  0x46   :  { %2110 = vsyncadd [#allocation3], 4294967168 }
  0x47   :  { %2111 = dma.done.wait [#allocation6], 8320  }
  0x48   :  { %2112 = vsyncadd [#allocation6], 4294958976 }
  0x49   :  { %2113 = dma.done.wait [#allocation9], 256  }
  0x4a   :  { %2114 = vsyncadd [#allocation9], 4294967040 }
  0x4b   :  { %2115 = dma.done.wait [#allocation12], 8192  }
  0x4c   :  { %2116 = vsyncadd [#allocation12], 4294959104  ;;  %v105_v0 = vld [vmem:[#allocation2] sm:$0xff]  ;;  %v176_v1 = vld [vmem:[#allocation5 + $0x1c0] sm:$0xff]  ;;  %v2131_v52 = vmov 0   ;;  %s2132_s4 = smov [#allocation14]  }
  0x4d   :  { %106 = vadd.xlane.f32.xlu0 %v105_v0  ;;  %v180_v2 = vld [vmem:[#allocation5 + $0x1e0] sm:$0xff]  ;;  %v177_v3 = vld [vmem:[#allocation5 + $0x1c8] sm:$0xff]  ;;  %578 = vmatprep.mubr.bf16.mxu0 %v2131_v52  ;;  %v178_v62 = vld [vmem:[#allocation5 + $0x1d0] sm:$0xff]  ;;  %s1616_s5 = sshll.u32 %s2132_s4, 4  ;;  %s1617_s5 = int_to_ptr.vmem [resolvable:$true] %s1616_s5 }
  0x4e   :  { %v1689_v4 = vcombine.high %v176_v1, %v180_v2  ;;  %v181_v5 = vld [vmem:[#allocation5 + $0x1e8] sm:$0xff]  ;;  %v1688_v6 = vcombine.low %v176_v1, %v180_v2  ;;  %v168_v7 = vld [vmem:[#allocation5 + $0x180] sm:$0xff]  ;;  %v182_v63 = vld [vmem:[#allocation5 + $0x1f0] sm:$0xff]  ;;  %619 = vmatprep.mubr.bf16.mxu1 %v2131_v52  ;;  %s2069_s13 = scalar_lea.vmem %s1617_s5, 128  ;;  %p2074_p3 = scmp.lt.s32.totalorder %s1617_s5, %s1617_s5 }
  0x4f   :  { %v172_v8 = vld [vmem:[#allocation5 + $0x1a0] sm:$0xff]  ;;  %v1691_v9 = vcombine.high %v177_v3, %v181_v5  ;;  %v1690_v10 = vcombine.low %v177_v3, %v181_v5  ;;  %v169_v12 = vld [vmem:[#allocation5 + $0x188] sm:$0xff]  ;;  %v1692_v3 = vcombine.low %v178_v62, %v182_v63  ;;  %p2070_p2 = scmp.ne.s32.totalorder %s1617_s5, %s2069_s13  ;;  %p2075_p4 = scmp.lt.s32.totalorder %s2069_s13, %s2069_s13 }
  0x50   :  { %v1681_v11 = vcombine.high %v168_v7, %v172_v8  ;;  %v173_v13 = vld [vmem:[#allocation5 + $0x1a8] sm:$0xff]  ;;  %v160_v14 = vld [vmem:[#allocation5 + $0x140] sm:$0xff]  ;;  %546 = vmatprep.subr.bf16.mxu0 %v1689_v4  ;;  %v1680_v19 = vcombine.low %v168_v7, %v172_v8  ;;  %v183_v4 = vld [vmem:[#allocation5 + $0x1f8] sm:$0xff] }
  0x51   :  { %v1683_v15 = vcombine.high %v169_v12, %v173_v13  ;;  %v164_v16 = vld [vmem:[#allocation5 + $0x160] sm:$0xff]  ;;  %v161_v17 = vld [vmem:[#allocation5 + $0x148] sm:$0xff]  ;;  %587 = vmatprep.subr.bf16.mxu1 %v1691_v9  ;;  %547 = vmatpush1.bf16.msra.mxu0 %v1688_v6  ;;  %v1682_v20 = vcombine.low %v169_v12, %v173_v13  ;;  %v1693_v12 = vcombine.high %v178_v62, %v182_v63  ;;  %p2076_p5 = por %p2075_p4, %p2074_p3 }
  0x52   :  { %v165_v18 = vld [vmem:[#allocation5 + $0x168] sm:$0xff]  ;;  %588 = vmatpush1.bf16.msra.mxu1 %v1690_v10  ;;  %548 = vmatprep.subr.bf16.mxu0 %v1681_v11  ;;  %v1673_v21 = vcombine.high %v160_v14, %v164_v16  ;;  %v1672_v23 = vcombine.low %v160_v14, %v164_v16  ;;  %v152_v29 = vld [vmem:[#allocation5 + $0x100] sm:$0xff] }
  0x53   :  { %589 = vmatprep.subr.bf16.mxu1 %v1683_v15  ;;  %v1675_v22 = vcombine.high %v161_v17, %v165_v18  ;;  %v1674_v24 = vcombine.low %v161_v17, %v165_v18  ;;  %v156_v30 = vld [vmem:[#allocation5 + $0x120] sm:$0xff]  ;;  %v153_v31 = vld [vmem:[#allocation5 + $0x108] sm:$0xff]  ;;  %v170_v17 = vld [vmem:[#allocation5 + $0x190] sm:$0xff]  ;;  %p2077_p6 = pnand %p2076_p5, %p2070_p2 }
  0x54   :  { %v1665_v32 = vcombine.high %v152_v29, %v156_v30  ;;  %v157_v33 = vld [vmem:[#allocation5 + $0x128] sm:$0xff]  ;;  %v1664_v35 = vcombine.low %v152_v29, %v156_v30  ;;  %v144_v37 = vld [vmem:[#allocation5 + $0xc0] sm:$0xff]  ;;  %v163_v29 = vld [vmem:[#allocation5 + $0x158] sm:$0xff] }
  0x55   :  { %549 = vmatpush1.bf16.msra.mxu0 %v1680_v19  ;;  %v1667_v34 = vcombine.high %v153_v31, %v157_v33  ;;  %v1666_v36 = vcombine.low %v153_v31, %v157_v33  ;;  %v148_v38 = vld [vmem:[#allocation5 + $0xe0] sm:$0xff]  ;;  %v145_v39 = vld [vmem:[#allocation5 + $0xc8] sm:$0xff]  ;;  %v174_v19 = vld [vmem:[#allocation5 + $0x1b0] sm:$0xff] }
  0x56   :  { %590 = vmatpush1.bf16.msra.mxu1 %v1682_v20  ;;  %550 = vmatprep.subr.bf16.mxu0 %v1673_v21  ;;  %v1657_v40 = vcombine.high %v144_v37, %v148_v38  ;;  %v149_v41 = vld [vmem:[#allocation5 + $0xe8] sm:$0xff]  ;;  %v1656_v43 = vcombine.low %v144_v37, %v148_v38  ;;  %v136_v45 = vld [vmem:[#allocation5 + $0x80] sm:$0xff]  ;;  %v171_v20 = vld [vmem:[#allocation5 + $0x198] sm:$0xff]  ;;  %v1684_v31 = vcombine.low %v170_v17, %v174_v19 }
  0x57   :  { %591 = vmatprep.subr.bf16.mxu1 %v1675_v22  ;;  %v1659_v42 = vcombine.high %v145_v39, %v149_v41  ;;  %v1658_v44 = vcombine.low %v145_v39, %v149_v41  ;;  %v140_v46 = vld [vmem:[#allocation5 + $0xa0] sm:$0xff]  ;;  %v137_v47 = vld [vmem:[#allocation5 + $0x88] sm:$0xff]  ;;  %v175_v21 = vld [vmem:[#allocation5 + $0x1b8] sm:$0xff] }
  0x58   :  { %v1649_v48 = vcombine.high %v136_v45, %v140_v46  ;;  %v141_v49 = vld [vmem:[#allocation5 + $0xa8] sm:$0xff]  ;;  %v128_v50 = vld [vmem:[#allocation5 + $0x40] sm:$0xff]  ;;  %v1648_v54 = vcombine.low %v136_v45, %v140_v46  ;;  %v167_v30 = vld [vmem:[#allocation5 + $0x178] sm:$0xff] }
  0x59   :  { %551 = vmatpush1.bf16.msra.mxu0 %v1672_v23  ;;  %v132_v51 = vld [vmem:[#allocation5 + $0x60] sm:$0xff]  ;;  %v1651_v53 = vcombine.high %v137_v47, %v141_v49  ;;  %v129_v55 = vld [vmem:[#allocation5 + $0x48] sm:$0xff]  ;;  %v1650_v57 = vcombine.low %v137_v47, %v141_v49  ;;  %v1679_v33 = vcombine.high %v163_v29, %v167_v30  ;;  %v159_v37 = vld [vmem:[#allocation5 + $0x138] sm:$0xff]  ;;  %v1678_v39 = vcombine.low %v163_v29, %v167_v30 }
  0x5a   :  { %592 = vmatpush1.bf16.msra.mxu1 %v1674_v24  ;;  %552 = vmatprep.subr.bf16.mxu0 %v1665_v32  ;;  %v133_v56 = vld [vmem:[#allocation5 + $0x68] sm:$0xff]  ;;  %v1641_v58 = vcombine.high %v128_v50, %v132_v51  ;;  %v120_v59 = vld [vmem:[#allocation5] sm:$0xff]  ;;  %v1640_v5 = vcombine.low %v128_v50, %v132_v51  ;;  %v1685_v24 = vcombine.high %v170_v17, %v174_v19  ;;  %v151_v45 = vld [vmem:[#allocation5 + $0xf8] sm:$0xff] }
  0x5b   :  { %593 = vmatprep.subr.bf16.mxu1 %v1667_v34  ;;  %v124_v60 = vld [vmem:[#allocation5 + $0x20] sm:$0xff]  ;;  %v1643_v61 = vcombine.high %v129_v55, %v133_v56  ;;  %v121_v1 = vld [vmem:[#allocation5 + $0x8] sm:$0xff]  ;;  %v1642_v7 = vcombine.low %v129_v55, %v133_v56  ;;  %v1686_v32 = vcombine.low %v171_v20, %v175_v21  ;;  %v154_v34 = vld [vmem:[#allocation5 + $0x110] sm:$0xff] }
  0x5c   :  { %v125_v2 = vld [vmem:[#allocation5 + $0x28] sm:$0xff]  ;;  %v1633_v8 = vcombine.high %v120_v59, %v124_v60  ;;  %v1632_v10 = vcombine.low %v120_v59, %v124_v60  ;;  %v138_v50 = vld [vmem:[#allocation5 + $0x90] sm:$0xff]  ;;  %v131_v60 = vld [vmem:[#allocation5 + $0x58] sm:$0xff] }
  0x5d   :  { %553 = vmatpush1.bf16.msra.mxu0 %v1664_v35  ;;  %v1635_v9 = vcombine.high %v121_v1, %v125_v2  ;;  %v1634_v11 = vcombine.low %v121_v1, %v125_v2  ;;  %v158_v35 = vld [vmem:[#allocation5 + $0x130] sm:$0xff] }
  0x5e   :  { %594 = vmatpush1.bf16.msra.mxu1 %v1666_v36  ;;  %554 = vmatprep.subr.bf16.mxu0 %v1657_v40  ;;  %v155_v36 = vld [vmem:[#allocation5 + $0x118] sm:$0xff]  ;;  %v1669_v40 = vcombine.high %v154_v34, %v158_v35  ;;  %v1668_v46 = vcombine.low %v154_v34, %v158_v35  ;;  %v142_v51 = vld [vmem:[#allocation5 + $0xb0] sm:$0xff] }
  0x5f   :  { %595 = vmatprep.subr.bf16.mxu1 %v1659_v42  ;;  %v1671_v41 = vcombine.high %v155_v36, %v159_v37  ;;  %v146_v42 = vld [vmem:[#allocation5 + $0xd0] sm:$0xff]  ;;  %v1670_v47 = vcombine.low %v155_v36, %v159_v37  ;;  %v1653_v56 = vcombine.high %v138_v50, %v142_v51  ;;  %v1652_v62 = vcombine.low %v138_v50, %v142_v51 }
  0x60   :  { %v134_v59 = vld [vmem:[#allocation5 + $0x70] sm:$0xff] }
  0x61   :  { %555 = vmatpush1.bf16.msra.mxu0 %v1656_v43  ;;  %v150_v43 = vld [vmem:[#allocation5 + $0xf0] sm:$0xff] }
  0x62   :  { %596 = vmatpush1.bf16.msra.mxu1 %v1658_v44  ;;  %556 = vmatprep.subr.bf16.mxu0 %v1649_v48  ;;  %v147_v44 = vld [vmem:[#allocation5 + $0xd8] sm:$0xff]  ;;  %v1661_v48 = vcombine.high %v146_v42, %v150_v43  ;;  %v122_v2 = vld [vmem:[#allocation5 + $0x10] sm:$0xff] }
  0x63   :  { %597 = vmatprep.subr.bf16.mxu1 %v1651_v53  ;;  %v1663_v49 = vcombine.high %v147_v44, %v151_v45  ;;  %v143_v53 = vld [vmem:[#allocation5 + $0xb8] sm:$0xff]  ;;  %v1662_v55 = vcombine.low %v147_v44, %v151_v45 }
  0x65   :  { %557 = vmatpush1.bf16.msra.mxu0 %v1648_v54  ;;  %v1660_v54 = vcombine.low %v146_v42, %v150_v43 }
  0x66   :  { %598 = vmatpush1.bf16.msra.mxu1 %v1650_v57  ;;  %558 = vmatprep.subr.bf16.mxu0 %v1641_v58  ;;  %v130_v58 = vld [vmem:[#allocation5 + $0x50] sm:$0xff] }
  0x67   :  { %599 = vmatprep.subr.bf16.mxu1 %v1643_v61  ;;  %v135_v61 = vld [vmem:[#allocation5 + $0x78] sm:$0xff] }
  0x68   :  { %v1647_v1 = vcombine.high %v131_v60, %v135_v61 }
  0x69   :  { %559 = vmatpush1.bf16.msra.mxu0 %v1640_v5  ;;  %v127_v5 = vld [vmem:[#allocation5 + $0x38] sm:$0xff] }
  0x6a   :  { %600 = vmatpush1.bf16.msra.mxu1 %v1642_v7  ;;  %560 = vmatprep.subr.bf16.mxu0 %v1633_v8  ;;  %v1646_v7 = vcombine.low %v131_v60, %v135_v61 }
  0x6b   :  { %601 = vmatprep.subr.bf16.mxu1 %v1635_v9 }
  0x6d   :  { %561 = vmatpush1.bf16.msra.mxu0 %v1632_v10 }
  0x6e   :  { %602 = vmatpush1.bf16.msra.mxu1 %v1634_v11  ;;  %628 = vmatprep.subr.bf16.mxu0 %v1693_v12  ;;  %v186_v12 = vlaneseq }
  0xd6   :  { %v107_v25 = vpop.xlane.xlu0 %106 }
  0xd7   :  { %v109_v26 = vmul.f32 0.0078125, %v107_v25  ;;  %v1687_v25 = vcombine.high %v171_v20, %v175_v21 }
  0xd9   :  { %v2197_v27 = vsub.f32 %v105_v0, %v109_v26  ;;  %v179_v0 = vld [vmem:[#allocation5 + $0x1d8] sm:$0xff]  ;;  %v162_v26 = vld [vmem:[#allocation5 + $0x150] sm:$0xff] }
  0xda   :  { %v1694_v6 = vcombine.low %v179_v0, %v183_v4  ;;  %v1695_v13 = vcombine.high %v179_v0, %v183_v4  ;;  %v1645_v0 = vcombine.high %v130_v58, %v134_v59  ;;  %v123_v4 = vld [vmem:[#allocation5 + $0x18] sm:$0xff] }
  0xdb   :  { %v111_v28 = vmul.f32 %v2197_v27, %v2197_v27  ;;  %v1639_v9 = vcombine.high %v123_v4, %v127_v5  ;;  %v1638_v11 = vcombine.low %v123_v4, %v127_v5 }
  0xdc   :  { %669 = vmatprep.subr.bf16.mxu1 %v1695_v13  ;;  %v187_v13 = vshrl.u32 %v186_v12, 7  ;;  %v1868_v12 = vld [vmem:[#allocation11 + $0xb8] sm:$0xff]  }
  0xdd   :  { %112 = vadd.xlane.f32.xlu0 %v111_v28  ;;  %v166_v28 = vld [vmem:[#allocation5 + $0x170] sm:$0xff] }
  0xde   :  { %v1676_v38 = vcombine.low %v162_v26, %v166_v28  ;;  %v2224_v35 = vsub.s32 4, %v187_v13  ;;  %v2226_v36 = vsub.s32 5, %v187_v13 }
 0x166   :  { %v113_v14 = vpop.xlane.xlu0 %112 }
 0x167   :  { %v114_v15 = vmul.f32 0.0078125, %v113_v14  ;;  %v2212_v14 = vsub.s32 0, %v187_v13 }
 0x169   :  { %v115_v16 = vadd.f32 1e-05, %v114_v15  ;;  %v184_v15 = vld [vmem:[#allocation7] sm:$0xff] }
 0x16a   :  { %v189_v17 = vrot.slane %v184_v15, %v2212_v14  ;;  %v205_v37 = vrot.slane %v184_v15, %v2224_v35 }
 0x16b   :  { %1927 = vrsqrt.f32 %v115_v16  ;;  %v2214_v16 = vsub.s32 3, %v187_v13 }
 0x16d   :  { %v201_v19 = vrot.slane %v184_v15, %v2214_v16 }
 0x178   :  { %v1928_v18 = vpop.eup %1927 }
 0x179   :  { %v117_v22 = vmul.f32 %v1928_v18, %v2197_v27  ;;  %v1677_v27 = vcombine.high %v162_v26, %v166_v28  ;;  %v2217_v18 = vsub.s32 1, %v187_v13 }
 0x17b   :  { %v2204_v23 = vpack.c.bf16 %v117_v22, %v117_v22  ;;  %118 = vst [vmem:[#allocation14] sm:$0xff] %v117_v22 }
 0x17d   :  { %579 = vmatmul.mubr.bf16.vlgmr.msra.gmra.mxu0 %v2204_v23  ;;  %620 = vmatmul.mubr.bf16.vlgmr.msra.gmra.mxu1 %v2204_v23 }
 0x17e   :  { %629 = vmatpush1.bf16.msra.mxu0 %v1692_v3  ;;  %670 = vmatpush1.bf16.msra.mxu1 %v1694_v6  ;;  %v126_v3 = vld [vmem:[#allocation5 + $0x30] sm:$0xff]  ;;  %v1644_v6 = vcombine.low %v130_v58, %v134_v59 }
 0x17f   :  { %630 = vmatprep.subr.bf16.mxu0 %v1685_v24  ;;  %671 = vmatprep.subr.bf16.mxu1 %v1687_v25  ;;  %v1637_v8 = vcombine.high %v122_v2, %v126_v3  ;;  %v1636_v10 = vcombine.low %v122_v2, %v126_v3  ;;  %v2220_v24 = vsub.s32 2, %v187_v13 }
 0x180   :  { %660 = vmatprep.mubr.bf16.mxu0 %v2131_v52  ;;  %701 = vmatprep.mubr.bf16.mxu1 %v2131_v52  ;;  %v139_v52 = vld [vmem:[#allocation5 + $0x98] sm:$0xff] }
 0x181   :  { %v1655_v57 = vcombine.high %v139_v52, %v143_v53  ;;  %v1654_v63 = vcombine.low %v139_v52, %v143_v53 }
 0x182   :  { %631 = vmatpush1.bf16.msra.mxu0 %v1684_v31  ;;  %672 = vmatpush1.bf16.msra.mxu1 %v1686_v32  ;;  %v197_v31 = vrot.slane %v184_v15, %v2220_v24 }
 0x183   :  { %632 = vmatprep.subr.bf16.mxu0 %v1677_v27  ;;  %673 = vmatprep.subr.bf16.mxu1 %v1679_v33 }
 0x186   :  { %633 = vmatpush1.bf16.msra.mxu0 %v1676_v38  ;;  %674 = vmatpush1.bf16.msra.mxu1 %v1678_v39  ;;  %v2229_v38 = vsub.s32 6, %v187_v13  ;;  %v209_v39 = vrot.slane %v184_v15, %v2226_v36 }
 0x187   :  { %634 = vmatprep.subr.bf16.mxu0 %v1669_v40  ;;  %675 = vmatprep.subr.bf16.mxu1 %v1671_v41  ;;  %v2232_v40 = vsub.s32 7, %v187_v13  ;;  %v1869_v13 = vld [vmem:[#allocation11 + $0x68] sm:$0xff]  }
 0x188   :  { %v213_v44 = vrot.slane %v184_v15, %v2229_v38 }
 0x18a   :  { %635 = vmatpush1.bf16.msra.mxu0 %v1668_v46  ;;  %676 = vmatpush1.bf16.msra.mxu1 %v1670_v47 }
 0x18b   :  { %636 = vmatprep.subr.bf16.mxu0 %v1661_v48  ;;  %677 = vmatprep.subr.bf16.mxu1 %v1663_v49  ;;  %v217_v48 = vrot.slane %v184_v15, %v2232_v40 }
 0x18e   :  { %637 = vmatpush1.bf16.msra.mxu0 %v1660_v54  ;;  %678 = vmatpush1.bf16.msra.mxu1 %v1662_v55 }
 0x18f   :  { %638 = vmatprep.subr.bf16.mxu0 %v1653_v56  ;;  %679 = vmatprep.subr.bf16.mxu1 %v1655_v57 }
 0x192   :  { %639 = vmatpush1.bf16.msra.mxu0 %v1652_v62  ;;  %680 = vmatpush1.bf16.msra.mxu1 %v1654_v63 }
 0x193   :  { %640 = vmatprep.subr.bf16.mxu0 %v1645_v0  ;;  %681 = vmatprep.subr.bf16.mxu1 %v1647_v1 }
 0x196   :  { %641 = vmatpush1.bf16.msra.mxu0 %v1644_v6  ;;  %682 = vmatpush1.bf16.msra.mxu1 %v1646_v7  ;;  %v1863_v7 = vld [vmem:[#allocation11 + $0x78] sm:$0xff]  }
 0x197   :  { %642 = vmatprep.subr.bf16.mxu0 %v1637_v8  ;;  %683 = vmatprep.subr.bf16.mxu1 %v1639_v9  ;;  %v1864_v8 = vld [vmem:[#allocation11 + $0x38] sm:$0xff]   ;;  %v1865_v9 = vld [vmem:[#allocation11 + $0x70] sm:$0xff]  }
 0x19a   :  { %643 = vmatpush1.bf16.msra.mxu0 %v1636_v10  ;;  %684 = vmatpush1.bf16.msra.mxu1 %v1638_v11  ;;  %v1866_v10 = vld [vmem:[#allocation11 + $0xf8] sm:$0xff]   ;;  %v1867_v11 = vld [vmem:[#allocation11 + $0x30] sm:$0xff]  }
 0x19b   :  { %1762 = vmatprep.subr.bf16.mxu0 %v1863_v7  ;;  %1784 = vmatprep.subr.bf16.mxu1 %v1866_v10 }
 0x19d   :  { %661 = vmatmul.mubr.bf16.vlgmr.msra.gmra.mxu0 %v2204_v23  ;;  %702 = vmatmul.mubr.bf16.vlgmr.msra.gmra.mxu1 %v2204_v23  ;;  %v193_v23 = vrot.slane %v184_v15, %v2217_v18  ;;  %v1870_v15 = vld [vmem:[#allocation11 + $0xf0] sm:$0xff]  }
 0x19e   :  { %1763 = vmatpush3.bf16.msra.mxu0 %v1864_v8  ;;  %1785 = vmatpush3.bf16.msra.mxu1 %v1868_v12 }
 0x19f   :  { %1764 = vmatprep.subr.bf16.mxu0 %v1865_v9  ;;  %1786 = vmatprep.subr.bf16.mxu1 %v1870_v15 }
 0x1a2   :  { %1765 = vmatpush3.bf16.msra.mxu0 %v1867_v11 }
 0x1a3   :  { %1766 = vmatprep.subr.bf16.mxu0 %v1869_v13 }
 0x23d   :  { %v580_v20 = vpop.f32.mrf.mxu0  ;;  %v621_v21 = vpop.f32.mrf.mxu1 }
 0x23e   :  { %v581_v22 = vadd.f32 %v580_v20, %v189_v17  ;;  %v622_v34 = vadd.f32 %v621_v21, %v197_v31  ;;  %v1871_v17 = vld [vmem:[#allocation11 + $0x28] sm:$0xff]   ;;  %v1873_v20 = vld [vmem:[#allocation11 + $0x60] sm:$0xff]   ;;  %v1881_v31 = vld [vmem:[#allocation11 + $0x50] sm:$0xff]  }
 0x23f   :  { %v582_v25 = vpop.f32.mrf.mxu0  ;;  %v623_v26 = vpop.f32.mrf.mxu1  ;;  %1767 = vmatpush3.bf16.msra.mxu0 %v1871_v17  ;;  %v1874_v21 = vld [vmem:[#allocation11 + $0xe8] sm:$0xff]  }
 0x240   :  { %v624_v28 = vadd.f32 %v623_v26, %v201_v19  ;;  %710 = vadd.xlane.f32.xlu1 %v581_v22  ;;  %v583_v32 = vadd.f32 %v582_v25, %v193_v23  ;;  %v1872_v19 = vld [vmem:[#allocation11 + $0xb0] sm:$0xff]   ;;  %v1876_v23 = vld [vmem:[#allocation11 + $0xa8] sm:$0xff]   ;;  %1768 = vmatprep.subr.bf16.mxu0 %v1873_v20  ;;  %v1877_v25 = vld [vmem:[#allocation11 + $0x58] sm:$0xff]  }
 0x241   :  { %v584_v29 = vpop.f32.mrf.mxu0  ;;  %v625_v30 = vpop.f32.mrf.mxu1  ;;  %1787 = vmatpush3.bf16.msra.mxu1 %v1872_v19  ;;  %v1878_v26 = vld [vmem:[#allocation11 + $0xe0] sm:$0xff]   ;;  %v2284_v20 = vld [vmem:[#allocation8] sm:$0xff] }
 0x242   :  { %743 = vadd.xlane.f32.xlu0 %v624_v28  ;;  %1788 = vmatprep.subr.bf16.mxu1 %v1874_v21  ;;  %v1880_v29 = vld [vmem:[#allocation11 + $0xa0] sm:$0xff]   ;;  %v803_v21 = vrot.slane %v2284_v20, %v2212_v14 }
 0x243   :  { %v585_v27 = vpop.f32.mrf.mxu0  ;;  %v626_v33 = vpop.f32.mrf.mxu1 }
 0x244   :  { %721 = vadd.xlane.f32.xlu1 %v583_v32 }
 0x245   :  { %1789 = vmatpush3.bf16.msra.mxu1 %v1876_v23 }
 0x246   :  { %1790 = vmatprep.subr.bf16.mxu1 %v1878_v26 }
 0x248   :  { %732 = vadd.xlane.f32.xlu1 %v622_v34 }
 0x249   :  { %1791 = vmatpush3.bf16.msra.mxu1 %v1880_v29 }
 0x25d   :  { %v662_v41 = vpop.f32.mrf.mxu0  ;;  %v703_v42 = vpop.f32.mrf.mxu1 }
 0x25e   :  { %v2234_v43 = vadd.f32 %v662_v41, %v205_v37  ;;  %v2241_v51 = vadd.f32 %v703_v42, %v213_v44  ;;  %v1884_v42 = vld [vmem:[#allocation11 + $0x98] sm:$0xff]   ;;  %v1885_v44 = vld [vmem:[#allocation11 + $0x48] sm:$0xff]  }
 0x25f   :  { %v664_v45 = vpop.f32.mrf.mxu0  ;;  %v705_v46 = vpop.f32.mrf.mxu1 }
 0x260   :  { %v2237_v47 = vadd.f32 %v664_v45, %v209_v39  ;;  %754 = vadd.xlane.f32.xlu1 %v2234_v43  ;;  %v2244_v54 = vadd.f32 %v705_v46, %v217_v48  ;;  %v1883_v39 = vld [vmem:[#allocation11 + $0x10] sm:$0xff]  }
 0x261   :  { %v666_v49 = vpop.f32.mrf.mxu0  ;;  %v707_v50 = vpop.f32.mrf.mxu1 }
 0x262   :  { %765 = vadd.xlane.f32.xlu0 %v2237_v47  ;;  %v1886_v49 = vld [vmem:[#allocation11 + $0xd0] sm:$0xff]  }
 0x263   :  { %v667_v52 = vpop.f32.mrf.mxu0  ;;  %v708_v53 = vpop.f32.mrf.mxu1 }
 0x264   :  { %776 = vadd.xlane.f32.xlu1 %v2241_v51 }
 0x266   :  { %787 = vadd.xlane.f32.xlu0 %v2244_v54 }
 0x2c9   :  { %v711_v55 = vpop.xlane.xlu1 %710 }
 0x2ca   :  { %v712_v56 = vmul.f32 0.0078125, %v711_v55  ;;  %v1887_v55 = vld [vmem:[#allocation11 + $0x8] sm:$0xff]  }
 0x2cb   :  { %v744_v57 = vpop.xlane.xlu0 %743 }
 0x2cc   :  { %v2248_v58 = vsub.f32 %v581_v22, %v712_v56  ;;  %v745_v60 = vmul.f32 0.0078125, %v744_v57  ;;  %v1875_v22 = vld [vmem:[#allocation11 + $0x20] sm:$0xff]  }
 0x2cd   :  { %v722_v59 = vpop.xlane.xlu1 %721  ;;  %1769 = vmatpush3.bf16.msra.mxu0 %v1875_v22  ;;  %v1889_v56 = vld [vmem:[#allocation11 + $0x40] sm:$0xff]   ;;  %v2288_v22 = vld [vmem:[#allocation10] sm:$0xff] }
 0x2ce   :  { %v723_v61 = vmul.f32 0.0078125, %v722_v59  ;;  %v714_v62 = vmul.f32 %v2248_v58, %v2248_v58  ;;  %v2254_v1 = vsub.f32 %v624_v28, %v745_v60  ;;  %v1879_v28 = vld [vmem:[#allocation11 + $0x18] sm:$0xff]   ;;  %1770 = vmatprep.subr.bf16.mxu0 %v1877_v25  ;;  %v853_v26 = vrot.slane %v2288_v22, %v2212_v14 }
 0x2d0   :  { %v2252_v63 = vsub.f32 %v583_v32, %v723_v61  ;;  %715 = vadd.xlane.f32.xlu1 %v714_v62  ;;  %v747_v5 = vmul.f32 %v2254_v1, %v2254_v1  ;;  %v1882_v32 = vld [vmem:[#allocation11 + $0xd8] sm:$0xff]   ;;  %v1891_v61 = vld [vmem:[#allocation11] sm:$0xff]   ;;  %v1892_v62 = vld [vmem:[#allocation11 + $0x88] sm:$0xff]  }
 0x2d1   :  { %v733_v0 = vpop.xlane.xlu1 %732  ;;  %1771 = vmatpush3.bf16.msra.mxu0 %v1879_v28  ;;  %1792 = vmatprep.subr.bf16.mxu1 %v1882_v32  ;;  %v807_v28 = vrot.slane %v2284_v20, %v2217_v18  ;;  %v857_v32 = vrot.slane %v2288_v22, %v2217_v18  ;;  %v861_v18 = vrot.slane %v2288_v22, %v2220_v24 }
 0x2d2   :  { %v734_v2 = vmul.f32 0.0078125, %v733_v0  ;;  %v725_v3 = vmul.f32 %v2252_v63, %v2252_v63  ;;  %1772 = vmatprep.subr.bf16.mxu0 %v1881_v31  ;;  %1793 = vmatpush3.bf16.msra.mxu1 %v1884_v42  ;;  %v1894_v0 = vld [vmem:[#allocation11 + $0x178] sm:$0xff]  }
 0x2d3   :  { %1794 = vmatprep.subr.bf16.mxu1 %v1886_v49 }
 0x2d4   :  { %v2258_v4 = vsub.f32 %v622_v34, %v734_v2  ;;  %726 = vadd.xlane.f32.xlu0 %v725_v3  ;;  %v1895_v2 = vld [vmem:[#allocation11 + $0x80] sm:$0xff]   ;;  %v1897_v3 = vld [vmem:[#allocation11 + $0x1f8] sm:$0xff]  }
 0x2d5   :  { %1773 = vmatpush3.bf16.msra.mxu0 %v1883_v39 }
 0x2d6   :  { %v736_v6 = vmul.f32 %v2258_v4, %v2258_v4  ;;  %1774 = vmatprep.subr.bf16.mxu0 %v1885_v44  ;;  %v865_v44 = vrot.slane %v2288_v22, %v2214_v16 }
 0x2d8   :  { %748 = vadd.xlane.f32.xlu0 %v747_v5  ;;  %737 = vadd.xlane.f32.xlu1 %v736_v6 }
 0x2d9   :  { %1775 = vmatpush3.bf16.msra.mxu0 %v1887_v55 }
 0x2da   :  { %1776 = vmatprep.subr.bf16.mxu0 %v1889_v56 }
 0x2dd   :  { %1777 = vmatpush3.bf16.msra.mxu0 %v1891_v61 }
 0x2de   :  { %1806 = vmatprep.subr.bf16.mxu0 %v1894_v0  ;;  %v1900_v0 = vld [vmem:[#allocation11 + $0x1b8] sm:$0xff]  }
 0x2e9   :  { %v755_v30 = vpop.xlane.xlu1 %754 }
 0x2ea   :  { %v756_v27 = vmul.f32 0.0078125, %v755_v30 }
 0x2eb   :  { %v766_v33 = vpop.xlane.xlu0 %765 }
 0x2ec   :  { %v2265_v34 = vsub.f32 %v2234_v43, %v756_v27  ;;  %v767_v37 = vmul.f32 0.0078125, %v766_v33 }
 0x2ed   :  { %v777_v41 = vpop.xlane.xlu1 %776 }
 0x2ee   :  { %v2268_v45 = vsub.f32 %v2237_v47, %v767_v37  ;;  %v778_v46 = vmul.f32 0.0078125, %v777_v41  ;;  %v758_v48 = vmul.f32 %v2265_v34, %v2265_v34  ;;  %v1888_v47 = vld [vmem:[#allocation11 + $0x90] sm:$0xff]   ;;  %v815_v37 = vrot.slane %v2284_v20, %v2214_v16 }
 0x2ef   :  { %v788_v50 = vpop.xlane.xlu0 %787  ;;  %1795 = vmatpush3.bf16.msra.mxu1 %v1888_v47 }
 0x2f0   :  { %v2273_v43 = vsub.f32 %v2241_v51, %v778_v46  ;;  %v789_v52 = vmul.f32 0.0078125, %v788_v50  ;;  %759 = vadd.xlane.f32.xlu1 %v758_v48  ;;  %v769_v53 = vmul.f32 %v2268_v45, %v2268_v45  ;;  %v1890_v51 = vld [vmem:[#allocation11 + $0xc8] sm:$0xff]  }
 0x2f1   :  { %1796 = vmatprep.subr.bf16.mxu1 %v1890_v51 }
 0x2f2   :  { %v2278_v57 = vsub.f32 %v2244_v54, %v789_v52  ;;  %770 = vadd.xlane.f32.xlu0 %v769_v53  ;;  %v780_v59 = vmul.f32 %v2273_v43, %v2273_v43  ;;  %v1893_v54 = vld [vmem:[#allocation11 + $0xc0] sm:$0xff]   ;;  %v1896_v53 = vld [vmem:[#allocation11 + $0x138] sm:$0xff]  }
 0x2f3   :  { %1797 = vmatpush3.bf16.msra.mxu1 %v1892_v62 }
 0x2f4   :  { %781 = vadd.xlane.f32.xlu1 %v780_v59  ;;  %v791_v60 = vmul.f32 %v2278_v57, %v2278_v57  ;;  %1798 = vmatprep.subr.bf16.mxu1 %v1893_v54  ;;  %v1898_v59 = vld [vmem:[#allocation11 + $0x170] sm:$0xff]  }
 0x2f5   :  { %v1899_v54 = vld [vmem:[#allocation11 + $0x130] sm:$0xff]  }
 0x2f6   :  { %792 = vadd.xlane.f32.xlu0 %v791_v60 }
 0x2f7   :  { %1799 = vmatpush3.bf16.msra.mxu1 %v1895_v2 }
 0x2f8   :  { %1828 = vmatprep.subr.bf16.mxu1 %v1897_v3 }
 0x359   :  { %v716_v5 = vpop.xlane.xlu1 %715 }
 0x35a   :  { %v717_v6 = vmul.f32 0.0078125, %v716_v5  ;;  %v1901_v5 = vld [vmem:[#allocation11 + $0x168] sm:$0xff]  }
 0x35c   :  { %v718_v7 = vadd.f32 1e-05, %v717_v6  ;;  %v1902_v6 = vld [vmem:[#allocation11 + $0x1f0] sm:$0xff]  }
 0x35d   :  { %v727_v8 = vpop.xlane.xlu0 %726 }
 0x35e   :  { %1929 = vrsqrt.f32 %v718_v7  ;;  %v728_v9 = vmul.f32 0.0078125, %v727_v8 }
 0x360   :  { %v729_v10 = vadd.f32 1e-05, %v728_v9 }
 0x361   :  { %v749_v11 = vpop.xlane.xlu0 %748  ;;  %v738_v12 = vpop.xlane.xlu1 %737 }
 0x362   :  { %1931 = vrsqrt.f32 %v729_v10  ;;  %v750_v13 = vmul.f32 0.0078125, %v749_v11  ;;  %v739_v15 = vmul.f32 0.0078125, %v738_v12  ;;  %v1903_v12 = vld [vmem:[#allocation11 + $0x128] sm:$0xff]  }
 0x364   :  { %v751_v17 = vadd.f32 1e-05, %v750_v13  ;;  %v740_v19 = vadd.f32 1e-05, %v739_v15  ;;  %v1904_v13 = vld [vmem:[#allocation11 + $0x1b0] sm:$0xff]   ;;  %v1905_v15 = vld [vmem:[#allocation11 + $0x160] sm:$0xff]  }
 0x366   :  { %1933 = vrsqrt.f32 %v751_v17  ;;  %v1906_v17 = vld [vmem:[#allocation11 + $0x1e8] sm:$0xff]  }
 0x367   :  { %1935 = vrsqrt.f32 %v740_v19 }
 0x36b   :  { %v1930_v23 = vpop.eup %1929 }
 0x36c   :  { %v720_v25 = vmul.f32 %v1930_v23, %v2248_v58  ;;  %v811_v58 = vrot.slane %v2284_v20, %v2220_v24  ;;  %v1908_v23 = vld [vmem:[#allocation11 + $0x1a8] sm:$0xff]  }
 0x36e   :  { %v840_v29 = vmul.f32 %v803_v21, %v720_v25  ;;  %v1907_v21 = vld [vmem:[#allocation11 + $0x120] sm:$0xff]   ;;  %v1909_v25 = vld [vmem:[#allocation11 + $0x158] sm:$0xff]  }
 0x36f   :  { %v1932_v30 = vpop.eup %1931 }
 0x370   :  { %v731_v31 = vmul.f32 %v1932_v30, %v2252_v63  ;;  %v890_v27 = vadd.f32 %v853_v26, %v840_v29  ;;  %v1910_v26 = vld [vmem:[#allocation11 + $0x1e0] sm:$0xff]   ;;  %v1913_v30 = vld [vmem:[#allocation11 + $0x150] sm:$0xff]  }
 0x371   :  { %v1912_v29 = vld [vmem:[#allocation11 + $0x1a0] sm:$0xff]  }
 0x372   :  { %v841_v33 = vmul.f32 %v807_v28, %v731_v31  ;;  %v898_v63 = vmax.f32 %v890_v27, 0.0  ;;  %v1911_v28 = vld [vmem:[#allocation11 + $0x118] sm:$0xff]  }
 0x373   :  { %v1934_v39 = vpop.eup %1933  ;;  %v1914_v31 = vld [vmem:[#allocation11 + $0x1d8] sm:$0xff]  }
 0x374   :  { %v1936_v14 = vpop.eup %1935  ;;  %v891_v41 = vadd.f32 %v857_v32, %v841_v33  ;;  %v753_v42 = vmul.f32 %v1934_v39, %v2254_v1  ;;  %v906_v56 = vpack.c.bf16 %v898_v63, %v898_v63  ;;  %v819_v32 = vrot.slane %v2284_v20, %v2224_v35  ;;  %v1915_v33 = vld [vmem:[#allocation11 + $0x110] sm:$0xff]  }
 0x375   :  { %v742_v46 = vmul.f32 %v1936_v14, %v2258_v4  ;;  %v823_v39 = vrot.slane %v2284_v20, %v2226_v36  ;;  %v827_v63 = vrot.slane %v2284_v20, %v2229_v38 }
 0x376   :  { %v899_v48 = vmax.f32 %v891_v41, 0.0  ;;  %v843_v49 = vmul.f32 %v815_v37, %v753_v42  ;;  %v1916_v37 = vld [vmem:[#allocation11 + $0x198] sm:$0xff]   ;;  %v1917_v41 = vld [vmem:[#allocation11 + $0x148] sm:$0xff]   ;;  %v1918_v42 = vld [vmem:[#allocation11 + $0x1d0] sm:$0xff]  }
 0x377   :  { %v842_v50 = vmul.f32 %v811_v58, %v742_v46 }
 0x378   :  { %v907_v52 = vpack.c.bf16 %v899_v48, %v899_v48  ;;  %v893_v55 = vadd.f32 %v865_v44, %v843_v49  ;;  %v869_v44 = vrot.slane %v2288_v22, %v2224_v35 }
 0x379   :  { %v760_v47 = vpop.xlane.xlu1 %759  ;;  %v892_v51 = vadd.f32 %v861_v18, %v842_v50  ;;  %v873_v18 = vrot.slane %v2288_v22, %v2226_v36  ;;  %v1920_v50 = vld [vmem:[#allocation11 + $0x190] sm:$0xff]   ;;  %v877_v36 = vrot.slane %v2288_v22, %v2229_v38 }
 0x37a   :  { %v761_v1 = vmul.f32 0.0078125, %v760_v47  ;;  %1465 = vmatprep.mubr.bf16.mxu0 %v907_v52  ;;  %v901_v60 = vmax.f32 %v893_v55, 0.0  ;;  %v1921_v47 = vld [vmem:[#allocation11 + $0x140] sm:$0xff]  }
 0x37b   :  { %v771_v16 = vpop.xlane.xlu0 %770  ;;  %1466 = vmatmul.mubr.bf16.vlgmr.msra.gmra.mxu0 %v906_v56  ;;  %v900_v61 = vmax.f32 %v892_v51, 0.0 }
 0x37c   :  { %v762_v4 = vadd.f32 1e-05, %v761_v1  ;;  %v772_v62 = vmul.f32 0.0078125, %v771_v16  ;;  %1807 = vmatpush3.bf16.msra.mxu0 %v1896_v53  ;;  %v909_v24 = vpack.c.bf16 %v901_v60, %v901_v60  ;;  %v831_v53 = vrot.slane %v2284_v20, %v2232_v40  ;;  %v1923_v20 = vld [vmem:[#allocation11 + $0x100] sm:$0xff]  }
 0x37d   :  { %v782_v2 = vpop.xlane.xlu1 %781  ;;  %1808 = vmatprep.subr.bf16.mxu0 %v1898_v59  ;;  %v908_v3 = vpack.c.bf16 %v900_v61, %v900_v61  ;;  %v881_v1 = vrot.slane %v2288_v22, %v2232_v40  ;;  %v1924_v61 = vld [vmem:[#allocation11 + $0x188] sm:$0xff]   ;;  %v1926_v40 = vld [vmem:[#allocation11 + $0x180] sm:$0xff]  }
 0x37e   :  { %1937 = vrsqrt.f32 %v762_v4  ;;  %v773_v7 = vadd.f32 1e-05, %v772_v62  ;;  %v783_v8 = vmul.f32 0.0078125, %v782_v2  ;;  %1505 = vmatprep.mubr.bf16.mxu1 %v909_v24  ;;  %v1925_v24 = vld [vmem:[#allocation11 + $0x1c0] sm:$0xff]  }
 0x37f   :  { %v793_v9 = vpop.xlane.xlu0 %792  ;;  %1506 = vmatmul.mubr.bf16.vlgmr.msra.gmra.mxu1 %v908_v3 }
 0x380   :  { %1939 = vrsqrt.f32 %v773_v7  ;;  %v784_v10 = vadd.f32 1e-05, %v783_v8  ;;  %v794_v11 = vmul.f32 0.0078125, %v793_v9  ;;  %1809 = vmatpush3.bf16.msra.mxu0 %v1899_v54  ;;  %1829 = vmatpush3.bf16.msra.mxu1 %v1900_v0 }
 0x381   :  { %1810 = vmatprep.subr.bf16.mxu0 %v1901_v5  ;;  %1830 = vmatprep.subr.bf16.mxu1 %v1902_v6 }
 0x382   :  { %1941 = vrsqrt.f32 %v784_v10  ;;  %v795_v19 = vadd.f32 1e-05, %v794_v11 }
 0x384   :  { %1943 = vrsqrt.f32 %v795_v19  ;;  %1811 = vmatpush3.bf16.msra.mxu0 %v1903_v12  ;;  %1831 = vmatpush3.bf16.msra.mxu1 %v1904_v13 }
 0x385   :  { %1812 = vmatprep.subr.bf16.mxu0 %v1905_v15  ;;  %1832 = vmatprep.subr.bf16.mxu1 %v1906_v17 }
 0x388   :  { %1813 = vmatpush3.bf16.msra.mxu0 %v1907_v21  ;;  %1833 = vmatpush3.bf16.msra.mxu1 %v1908_v23 }
 0x389   :  { %1814 = vmatprep.subr.bf16.mxu0 %v1909_v25  ;;  %1834 = vmatprep.subr.bf16.mxu1 %v1910_v26 }
 0x38b   :  { %v1938_v27 = vpop.eup %1937 }
 0x38c   :  { %1815 = vmatpush3.bf16.msra.mxu0 %v1911_v28  ;;  %1835 = vmatpush3.bf16.msra.mxu1 %v1912_v29  ;;  %v764_v58 = vmul.f32 %v1938_v27, %v2265_v34  ;;  %v1919_v34 = vld [vmem:[#allocation11 + $0x108] sm:$0xff]  }
 0x38d   :  { %v1940_v14 = vpop.eup %1939  ;;  %1816 = vmatprep.subr.bf16.mxu0 %v1913_v30  ;;  %1836 = vmatprep.subr.bf16.mxu1 %v1914_v31 }
 0x38e   :  { %v775_v46 = vmul.f32 %v1940_v14, %v2268_v45  ;;  %v844_v48 = vmul.f32 %v819_v32, %v764_v58  ;;  %v1922_v45 = vld [vmem:[#allocation11 + $0x1c8] sm:$0xff]  }
 0x38f   :  { %v1942_v49 = vpop.eup %1941 }
 0x390   :  { %1817 = vmatpush3.bf16.msra.mxu0 %v1915_v33  ;;  %1837 = vmatpush3.bf16.msra.mxu1 %v1916_v37  ;;  %v845_v52 = vmul.f32 %v823_v39, %v775_v46  ;;  %v786_v35 = vmul.f32 %v1942_v49, %v2273_v43  ;;  %v894_v56 = vadd.f32 %v869_v44, %v844_v48 }
 0x391   :  { %v1944_v55 = vpop.eup %1943  ;;  %1818 = vmatprep.subr.bf16.mxu0 %v1917_v41  ;;  %1838 = vmatprep.subr.bf16.mxu1 %v1918_v42 }
 0x392   :  { %v895_v59 = vadd.f32 %v873_v18, %v845_v52  ;;  %v797_v51 = vmul.f32 %v1944_v55, %v2278_v57  ;;  %v846_v60 = vmul.f32 %v827_v63, %v786_v35  ;;  %v902_v4 = vmax.f32 %v894_v56, 0.0 }
 0x394   :  { %1819 = vmatpush3.bf16.msra.mxu0 %v1919_v34  ;;  %1839 = vmatpush3.bf16.msra.mxu1 %v1920_v50  ;;  %v903_v43 = vmax.f32 %v895_v59, 0.0  ;;  %v847_v16 = vmul.f32 %v831_v53, %v797_v51  ;;  %v896_v38 = vadd.f32 %v877_v36, %v846_v60  ;;  %v910_v0 = vpack.c.bf16 %v902_v4, %v902_v4 }
 0x395   :  { %1820 = vmatprep.subr.bf16.mxu0 %v1921_v47  ;;  %1840 = vmatprep.subr.bf16.mxu1 %v1922_v45 }
 0x396   :  { %v911_v62 = vpack.c.bf16 %v903_v43, %v903_v43  ;;  %v897_v54 = vadd.f32 %v881_v1, %v847_v16  ;;  %v904_v2 = vmax.f32 %v896_v38, 0.0 }
 0x398   :  { %1821 = vmatpush3.bf16.msra.mxu0 %v1923_v20  ;;  %1545 = vmatprep.mubr.bf16.mxu0 %v911_v62  ;;  %v905_v57 = vmax.f32 %v897_v54, 0.0  ;;  %v912_v3 = vpack.c.bf16 %v904_v2, %v904_v2 }
 0x399   :  { %1841 = vmatpush3.bf16.msra.mxu1 %v1924_v61 }
 0x39a   :  { %1842 = vmatprep.subr.bf16.mxu1 %v1925_v24  ;;  %v913_v22 = vpack.c.bf16 %v905_v57, %v905_v57 }
 0x39b   :  { %1546 = vmatmul.mubr.bf16.vlgmr.msra.gmra.mxu0 %v910_v0 }
 0x39c   :  { %1585 = vmatprep.mubr.bf16.mxu1 %v913_v22 }
 0x39d   :  { %1843 = vmatpush3.bf16.msra.mxu1 %v1926_v40 }
 0x3a0   :  { %1586 = vmatmul.mubr.bf16.vlgmr.msra.gmra.mxu1 %v912_v3 }
 0x3a1   :  { %2080 = shalt.err (!%p2077_p6)
}
 0x3a2   :  { %1619 = dma.vmem_to_hbm [thread:$0]  %s1617_s5, 128, %s2345_s8, [#allocation15]   ;;  %v1696_v17 = vld [vmem:[%s2343_s6] ss:$0 sm:$0xff] }
 0x3a3   :  { %s2133_s6 = smov [#allocation13]  }
 0x3a4   :  { %s1606_s8 = sshll.u32 %s2133_s6, 4  ;;  %s1607_s8 = int_to_ptr.vmem [resolvable:$true] %s1606_s8 }
 0x3a5   :  { %s2089_s18 = scalar_lea.vmem %s1607_s8, 128  ;;  %p2094_p8 = scmp.lt.s32.totalorder %s1607_s8, %s1607_s8 }
 0x3a6   :  { %p2090_p7 = scmp.ne.s32.totalorder %s1607_s8, %s2089_s18  ;;  %p2095_p9 = scmp.lt.s32.totalorder %s2089_s18, %s2089_s18 }
 0x3a8   :  { %p2096_p10 = por %p2095_p9, %p2094_p8 }
 0x3aa   :  { %p2097_p11 = pnand %p2096_p10, %p2090_p7 }
 0x43b   :  { %v1778_v5 = vpop.f32.mrf.mxu0 }
 0x43d   :  { %v1779_v6 = vpop.f32.mrf.mxu0 }
 0x43e   :  { %v1780_v13 = vadd.f32 %v1779_v6, %v1778_v5 }
 0x43f   :  { %v1781_v7 = vpop.f32.mrf.mxu0  ;;  %v1800_v8 = vpop.f32.mrf.mxu1 }
 0x440   :  { %v1468_v23 = vadd.f32 %v1780_v13, %v1696_v17 }
 0x441   :  { %v1782_v9 = vpop.f32.mrf.mxu0  ;;  %v1801_v10 = vpop.f32.mrf.mxu1 }
 0x442   :  { %v1802_v19 = vadd.f32 %v1801_v10, %v1800_v8 }
 0x443   :  { %v1803_v11 = vpop.f32.mrf.mxu1 }
 0x444   :  { %v1508_v29 = vadd.f32 %v1802_v19, %v1468_v23 }
 0x445   :  { %v1804_v12 = vpop.f32.mrf.mxu1 }
 0x45b   :  { %v1822_v15 = vpop.f32.mrf.mxu0 }
 0x45d   :  { %v1823_v21 = vpop.f32.mrf.mxu0 }
 0x45e   :  { %v1824_v25 = vadd.f32 %v1823_v21, %v1822_v15 }
 0x45f   :  { %v1825_v26 = vpop.f32.mrf.mxu0 }
 0x460   :  { %v1844_v28 = vpop.f32.mrf.mxu1  ;;  %v1548_v32 = vadd.f32 %v1824_v25, %v1508_v29 }
 0x461   :  { %v1826_v30 = vpop.f32.mrf.mxu0 }
 0x462   :  { %v1845_v31 = vpop.f32.mrf.mxu1 }
 0x463   :  { %v1846_v27 = vadd.f32 %v1845_v31, %v1844_v28 }
 0x464   :  { %v1847_v33 = vpop.f32.mrf.mxu1 }
 0x465   :  { %v1588_v37 = vadd.f32 %v1846_v27, %v1548_v32 }
 0x466   :  { %v1848_v39 = vpop.f32.mrf.mxu1 }
 0x467   :  { %v1761_v58 = vmul.f32 -1.442695, %v1588_v37 }
 0x469   :  { %1945 = vpow2.f32 %v1761_v58 }
 0x476   :  { %v1946_v14 = vpop.eup %1945 }
 0x477   :  { %v1596_v41 = vadd.f32 1.0, %v1946_v14 }
 0x479   :  { %1947 = vrcp.f32 %v1596_v41 }
 0x486   :  { %v1948_v42 = vpop.eup %1947 }
 0x487   :  { %1599 = vst [vmem:[#allocation13] sm:$0xff] %v1948_v42 }
 0x488   :  { %2100 = shalt.err (!%p2097_p11)
}
 0x489   :  { %1609 = dma.vmem_to_hbm [thread:$0]  %s1607_s8, 128, %s2344_s7, [#allocation4]  }
 0x48a   :  { %2117 = dma.done.wait [#allocation4], 128  }
 0x48b   :  { %2118 = vsyncadd [#allocation4], 4294967168 }
 0x48c   :  { %2119 = dma.done.wait [#allocation15], 128  }
 0x48d   :  { %2120 = vsyncadd [#allocation15], 4294967168 }
 0x48e   :  { %1626 = vsyncpa [#allocation3], 1 }
 0x48f   :  { %1627 = vsyncpa [#allocation6], 1 }
 0x490   :  { %1628 = vsyncpa [#allocation9], 1 }
 0x491   :  { %1629 = vsyncpa [#allocation12], 1 }
 0x492   :  { %1630 = vsyncpa [#allocation4], 1 }
 0x493   :  { %1631 = vsyncpa [#allocation15], 1 }

</bundles_post_ra>
